<compile_context>
chip_gen: v7x
topology: tpu7x:2x2x1
jax: 0.10.0
libtpu: 0.0.40
codegen_flags: <defaults>
</compile_context>

<pallas_src>
import functools

import jax
import jax.numpy as jnp
from jax.experimental import pallas as pl
from jax.experimental.pallas import tpu as pltpu


def _pointwise_mlp_kernel(x_ref, wt_ref, b_ref, o_ref):
    # x_ref: (TN, K)   wt_ref: (K, TC) already K-major   b_ref: (1, TC)
    # Standard contraction -> MXU matmul with f32 accumulation.
    y = jnp.dot(x_ref[...], wt_ref[...], preferred_element_type=jnp.float32)
    y = y + b_ref[...].astype(jnp.float32)         # f32 epilogue on the VPU
    o_ref[...] = jnp.maximum(y, 0.0).astype(o_ref.dtype)


def _round_up(x, m):
    return ((x + m - 1) // m) * m


def _vmem_capacity_bytes():
    # Generation-aware capacity (128 MiB on v5e/v6e, 64 MiB/TC on v7x); fall
    # back to the smallest (v7x) figure if the query is unavailable.
    try:
        return int(pltpu.get_tpu_info().vmem_capacity_bytes)
    except Exception:
        return 64 * 1024 * 1024


def prepare_pointwise_mlp_params(w, b, dtype=None):
    """One-time parameter prep, hoisted out of the per-call path.

    w: (out_features, in_features) PyTorch layout -> K-major
    (in_features, out_features) weight plus a (1, out_features) bias row.
    Pass dtype=jnp.bfloat16 to trade precision for full-rate MXU + half the
    resident-weight footprint (accumulation stays f32 in the kernel).
    """
    wt = jnp.transpose(jnp.asarray(w))              # materialized once
    b2d = jnp.asarray(b).reshape(1, -1)
    if dtype is not None:
        wt = wt.astype(dtype)
    return wt, b2d


@functools.partial(jax.jit, static_argnames=("block_rows",))
def pointwise_mlp(x, wt, b2d, *, block_rows=1024):
    """relu(x @ wt + b). x: (..., K); wt: (K, Hout) K-major; b2d: (1, Hout)."""
    K = x.shape[-1]
    lead = x.shape[:-1]
    Hout = wt.shape[1]
    assert wt.shape[0] == K and b2d.shape == (1, Hout)
    out_dtype = x.dtype

    x2d = x.reshape(-1, K)
    N = x2d.shape[0]

    x_item = jnp.dtype(x.dtype).itemsize
    o_item = jnp.dtype(out_dtype).itemsize
    w_item = jnp.dtype(wt.dtype).itemsize
    b_item = jnp.dtype(b2d.dtype).itemsize
    sub = max(8, 32 // min(x_item, o_item))         # sublane multiple (8 f32, 16 bf16)

    # ---- VMEM budgeting. Pallas double-buffers every input (even the
    # grid-invariant weight/bias), so all input tiles are counted twice.
    vmem_cap = _vmem_capacity_bytes()
    budget = (vmem_cap * 3) // 4

    # Output-column tiling: keep the (double-buffered) weight strip under ~40%
    # of the budget; keep the full weight resident when it already fits.
    weight_budget = (budget * 2) // 5
    if 2 * K * Hout * w_item <= weight_budget or Hout <= 128:
        TC, num_col_tiles = Hout, 1
    else:
        cols_cap = weight_budget // (2 * K * w_item)
        align = 256 if cols_cap >= 256 else 128     # v6e/v7x MXU is 2x256^2
        TC = max(128, (cols_cap // align) * align)
        TC = min(TC, Hout)
        num_col_tiles = pl.cdiv(Hout, TC)
        if num_col_tiles == 1:
            TC = Hout

    w_tile_bytes = 2 * (K * TC * w_item + TC * b_item)
    per_row_bytes = 2 * (K * x_item + TC * o_item)
    rows_cap = (budget - w_tile_bytes) // per_row_bytes
    if rows_cap < sub:
        # TODO(synk): add a trailing K-reduction grid axis ("arbitrary") with an
        # f32 VMEM accumulator for weights too large even for a 128-column strip.
        raise ValueError(
            f"PointWiseMLP weight (K={K}, Hout={Hout}, dtype={wt.dtype}) does "
            f"not fit the {budget >> 20} MiB VMEM budget even with column tiling.")

    # ---- Balanced row tiles (no dead-row padding); >= 2 tiles when possible so
    # both v7x TensorCores get work. For large, MXU-bound H consider rounding
    # TN up to a multiple of 256 as well.
    max_rows = int(min(block_rows, rows_cap))
    num_row_tiles = pl.cdiv(N, max_rows)
    if num_row_tiles < 2 and N > sub:
        num_row_tiles = 2
    TN = _round_up(pl.cdiv(N, num_row_tiles), sub)
    if TN >= N:
        TN = N                                      # single block: dims == array dims
    num_row_tiles = pl.cdiv(N, TN)

    vmem_need = w_tile_bytes + TN * per_row_bytes
    vmem_limit = int(min(vmem_cap, max(vmem_need + (4 << 20), 32 << 20)))

    out = pl.pallas_call(
        _pointwise_mlp_kernel,
        out_shape=jax.ShapeDtypeStruct((N, Hout), out_dtype),
        grid=(num_row_tiles, num_col_tiles),
        in_specs=[
            pl.BlockSpec((TN, K), lambda i, j: (i, 0)),   # activation tile (pipelined)
            pl.BlockSpec((K, TC), lambda i, j: (0, j)),   # K-major weight strip
            pl.BlockSpec((1, TC), lambda i, j: (0, j)),   # bias strip
        ],
        out_specs=pl.BlockSpec((TN, TC), lambda i, j: (i, j)),
        compiler_params=pltpu.CompilerParams(
            dimension_semantics=("parallel", "parallel"),  # independent tiles
            vmem_limit_bytes=vmem_limit,
        ),
    )(x2d, wt, b2d)

    return out.reshape(*lead, Hout)


if __name__ == "__main__":
    key = jax.random.PRNGKey(0)
    batch, seq, hidden = 2, 8, 32

    kx, kw, kb = jax.random.split(key, 3)
    x = jax.random.normal(kx, (batch, seq, hidden), dtype=jnp.float32)
    # Deterministic init mimicking nn.Linear's uniform(-1/sqrt(H), 1/sqrt(H))
    bound = 1.0 / (hidden ** 0.5)
    w = jax.random.uniform(kw, (hidden, hidden), minval=-bound, maxval=bound,
                           dtype=jnp.float32)
    b = jax.random.uniform(kb, (hidden,), minval=-bound, maxval=bound,
                           dtype=jnp.float32)

    # One-time parameter prep (transpose to K-major, bias -> (1, H)).
    wt, b2d = prepare_pointwise_mlp_params(w, b)

    out = pointwise_mlp(x, wt, b2d)
    out = jax.block_until_ready(out)

    # Reference check in plain JAX (PyTorch Linear: y = x @ W.T + b, then ReLU)
    ref = jnp.maximum(jnp.einsum("bsh,oh->bso", x, w) + b, 0.0)
    assert out.shape == (batch, seq, hidden)
    assert jnp.allclose(out, ref, atol=2e-5, rtol=2e-5)

    print("KERNEL_OK")
</pallas_src>

<mosaic_0001>
module attributes {stable_mosaic.version = 11 : i64} {
  func.func @_pointwise_mlp_kernel(%arg0: i32, %arg1: i32, %arg2: memref<8x32xf32, #tpu.memory_space<vmem>>, %arg3: memref<32x32xf32, #tpu.memory_space<vmem>>, %arg4: memref<1x32xf32, #tpu.memory_space<vmem>>, %arg5: memref<8x32xf32, #tpu.memory_space<vmem>>) attributes {dimension_semantics = [#tpu.dimension_semantics<parallel>, #tpu.dimension_semantics<parallel>], iteration_bounds = array<i64: 2, 1>, scalar_prefetch = 0 : i64, scratch_operands = 0 : i64, tpu.core_type = #tpu.core_type<tc>, window_params = [{transform_indices = @transform_0, window_bounds = array<i64: 8, 32>}, {transform_indices = @transform_1, window_bounds = array<i64: 32, 32>}, {transform_indices = @transform_2, window_bounds = array<i64: 1, 32>}, {transform_indices = @transform_3, window_bounds = array<i64: 8, 32>}]} {
    %c0 = arith.constant 0 : index
    %c0_0 = arith.constant 0 : index
    %0 = vector.load %arg2[%c0, %c0_0] : memref<8x32xf32, #tpu.memory_space<vmem>>, vector<8x32xf32>
    %c0_1 = arith.constant 0 : index
    %c0_2 = arith.constant 0 : index
    %1 = vector.load %arg3[%c0_1, %c0_2] : memref<32x32xf32, #tpu.memory_space<vmem>>, vector<32x32xf32>
    %cst = arith.constant dense<0.000000e+00> : vector<8x32xf32>
    %2 = tpu.matmul %0, %1, %cst {dimension_numbers = #tpu.dot_dimension_numbers<[1], [0], [0], [1], [0, 0, 1, 1], [], []>} : vector<8x32xf32>, vector<32x32xf32>, vector<8x32xf32> -> vector<8x32xf32>
    %c0_3 = arith.constant 0 : index
    %c0_4 = arith.constant 0 : index
    %3 = vector.load %arg4[%c0_3, %c0_4] : memref<1x32xf32, #tpu.memory_space<vmem>>, vector<1x32xf32>
    %4 = vector.broadcast %3 : vector<1x32xf32> to vector<8x32xf32>
    %5 = arith.addf %2, %4 : vector<8x32xf32>
    %cst_5 = arith.constant 0.000000e+00 : f32
    %6 = vector.broadcast %cst_5 : f32 to vector<8x32xf32>
    %7 = arith.maximumf %5, %6 : vector<8x32xf32>
    %c0_6 = arith.constant 0 : index
    %c0_7 = arith.constant 0 : index
    %8 = vector.load %arg5[%c0_6, %c0_7] : memref<8x32xf32, #tpu.memory_space<vmem>>, vector<8x32xf32>
    tpu.vector_store %arg5[%c0_6, %c0_7], %7 {strides = array<i32>} : memref<8x32xf32, #tpu.memory_space<vmem>>, vector<8x32xf32>,
    return
  }
  func.func @transform_0(%arg0: i32, %arg1: i32) -> (i32, i32) {
    %c0_i32 = arith.constant 0 : i32
    %c0_i32_0 = arith.constant 0 : i32
    return %arg0, %c0_i32 : i32, i32
  }
  func.func @transform_1(%arg0: i32, %arg1: i32) -> (i32, i32) {
    %c0_i32 = arith.constant 0 : i32
    %c0_i32_0 = arith.constant 0 : i32
    return %c0_i32, %arg1 : i32, i32
  }
  func.func @transform_2(%arg0: i32, %arg1: i32) -> (i32, i32) {
    %c0_i32 = arith.constant 0 : i32
    %c0_i32_0 = arith.constant 0 : i32
    return %c0_i32, %arg1 : i32, i32
  }
  func.func @transform_3(%arg0: i32, %arg1: i32) -> (i32, i32) {
    %c0_i32 = arith.constant 0 : i32
    return %arg0, %arg1 : i32, i32
  }
}

</mosaic_0001>

<bundles_post_ra>
// kernel: pointwise_mlp.1
= control target key start
LH: loop header
LB: loop body
LE: loop exit
PB: predicated region body
PF: predicated region fallthrough
CT: control target
= control target key end

     0   :  { %8 = vsyncpa [#allocation3], 0  ;;  %s951_s0 = inlined_call_operand.hbm [shape: f32[16,32], index: 0, kind: input, shape index: {}]   ;;  %s952_s1 = inlined_call_operand.hbm [shape: f32[32,32], index: 1, kind: input, shape index: {}]   ;;  %s953_s2 = inlined_call_operand.vmem [shape: f32[1,32], index: 2, kind: input, shape index: {}]   ;;  %s954_s3 = inlined_call_operand.hbm [shape: f32[16,32], index: 3, kind: output, shape index: {}]  }
   0x1   :  { %10 = vsyncpa [#allocation3 + $0x1], 0 }
   0x2   :  { %11 = vsyncpa [#allocation6], 0 }
   0x3   :  { %12 = vsyncpa [#allocation4], 0 }
   0x4   :  { %14 = vsyncpa [#allocation4 + $0x1], 0  ;;  %s734_s12 = smov 0   ;;  %s736_s13 = smov 0  }
   0x5   :  { %s738_s14 = smov 0   ;;  %s740_s15 = smov 0  }
   0x6   :  { %s742_s16 = smov 0   ;;  %s744_s17 = smov 0  }
   0x7 LB: > { %s442_s18 = sadd.s32 4294967295, %s704_s17   ;;  %s443_s19 = sadd.s32 4294967294, %s704_s17   ;;  %s704_s17 = sphi %s744_s17, %s20_s17   ;;  %s700_s16 = sphi %s742_s16, %s978_s16   ;;  %s696_s15 = sphi %s740_s15, %s977_s15   ;;  %s692_s14 = sphi %s738_s14, %s976_s14   ;;  %s688_s13 = sphi %s736_s13, %s975_s13   ;;  %s684_s12 = sphi %s734_s12, %s974_s12  }
   0x8   : > { %p52_p0 = scmp.ne.s32.totalorder %s688_s13, %s684_s12  ;;  %p768_p1 = scmp.eq.s32.totalorder %s442_s18, 0 }
   0x9   : > { %p772_p2 = scmp.eq.s32.totalorder %s442_s18, 1  ;;  %p136_p3 = scmp.eq.s32.totalorder %s443_s19, 1 }
   0xa   : > { %s959_s20 = scalar_select %p768_p1, 1, 0 }
   0xb   : > { %s960_s21 = scalar_select %p772_p2, 1, 0 }
   0xc   : > { %p778_p4 = por %p768_p1, %p52_p0  ;;  %p444_p5 = scmp.ge.s32.totalorder %s704_s17, 1 }
   0xd   : > { %p783_p6 = por %p136_p3, %p52_p0  ;;  %p143_p7 = scmp.lt.s32.totalorder %s704_s17, 3 }
   0xe   : > { %s961_s22 = scalar_select %p778_p4, 1, 0 }
   0xf   : > { %s962_s23 = scalar_select %p783_p6, 1, 0 }
  0x10   : > { %p788_p8 = pnand %p444_p5, %p143_p7  ;;  %s706_s25 = smov [#allocation5]  }
  0x11   : > { %s157_s26 = sshll.u32 %s706_s25, 4  ;;  %s32_s28 = sadd.s32 1, %s700_s16  ;;  %s158_s26 = int_to_ptr.vmem [resolvable:$true] %s157_s26 }
  0x12   : > { %s963_s24 = scalar_select %p788_p8, 1, 0 }
  0x13   : > { %p490_p9 = pneg %p788_p8  ;;  %s560_s4 = scalar_lea.hbm %s952_s1, 512 }
  0x14   : > { %p561_p12 = scmp.ne.s32.totalorder %s952_s1, %s560_s4  ;;  %p567_p5 = scmp.lt.u32.totalorder %s560_s4, %s952_s1 }
  0x15   : > { %p797_p11 = pnand %p490_p9, %p768_p1 }
  0x17   : > { %p562_p13 = pneg %p797_p11 }
  0x19   : > { %p563_p0 = pnand %p562_p13, %p561_p12 }
  0x1b   : > { %p564_p3 = pneg %p563_p0 }
  0x1d   : > { %p569_p7 = pnand %p567_p5, %p564_p3 }
  0x1f   : > { %572 = shalt.err (!%p569_p7)
}
  0x20   : > { %s573_s9 = scalar_lea.vmem %s158_s26, 512  ;;  %p581_p1 = scmp.lt.s32.totalorder %s158_s26, %s158_s26 }
  0x21   : > { %p574_p9 = scmp.ne.s32.totalorder %s158_s26, %s573_s9  ;;  %p582_p4 = scmp.lt.s32.totalorder %s573_s9, %s573_s9 }
  0x23   : > { %p576_p10 = pnand %p574_p9, %p562_p13  ;;  %p583_p8 = por %p582_p4, %p581_p1 }
  0x25   : > { %p577_p6 = pneg %p576_p10 }
  0x27   : > { %p584_p2 = pnand %p583_p8, %p577_p6 }
  0x29   : > { %587 = shalt.err (!%p584_p2)
}
  0x2a   : > { %s707_s10 = smov 128   ;;  %s708_s11 = smov 8  }
  0x2b   : > { %493 = dma.hbm_to_vmem [thread:$0]  (!%p797_p11), %s952_s1, 512, %s158_s26, [#allocation6], %s707_s10, %s707_s10, %s708_s11  }
  0x2c   : > { %p34_p1 = scmp.ge.s32.totalorder %s32_s28, 2  ;;  %s39_s25 = sadd.s32 1, %s692_s14 }
  0x2d   : > { %p46_p2 = scmp.ne.s32.totalorder %s692_s14, %s688_s13  ;;  %p47_p4 = scmp.eq.s32.totalorder %s704_s17, 0 }
  0x2e   : > { %s980_s28 = smov (%p34_p1, %s32_s28), 0  ;;  %p966_p8 = scmp.ne.s32.totalorder %s960_s21, 0 }
  0x2f   : > { %p824_p6 = por %p47_p4, %p46_p2  ;;  %s36_s27 = ssub.s32 %s700_s16, %s980_s28 }
  0x30   : > { %p830_p10 = por %p966_p8, %p46_p2  ;;  %p503_p12 = scmp.lt.s32.totalorder %s704_s17, 2 }
  0x31   : > { %p37_p11 = scmp.eq.s32.totalorder %s36_s27, 0  ;;  %s177_s26 = sand.u32 1, %s692_s14  }
  0x32   : > { %s448_s4 = sshll.u32 %s177_s26, 3  ;;  %s449_s6 = sshll.u32 %s700_s16, 7 }
  0x33   : > { %s839_s5 = scalar_select %p37_p11, %s692_s14, %s39_s25  }
  0x34   : > { %s845_s9 = scalar_lea.hbm %s951_s0, %s449_s6  ;;  %s181_s21 = scalar_lea.vmem [#allocation2], %s448_s4 }
  0x35   : > { %s188_s10 = sshll.u32 %s181_s21, 4  ;;  %p851_p13 = pnand %p503_p12, %p824_p6  ;;  %s847_s10 = int_to_ptr.vmem [resolvable:$true] %s188_s10 }
  0x36   : > { %s178_s18 = scalar_lea.sflag [#allocation3], %s177_s26  ;;  %s588_s19 = scalar_lea.hbm %s845_s9, 128 }
  0x37   : > { %p589_p0 = scmp.ne.s32.totalorder %s845_s9, %s588_s19  ;;  %p590_p3 = pneg %p851_p13 }
  0x38   : > { %s593_s4 = scalar_lea.hbm %s951_s0, 256  ;;  %p594_p9 = scmp.lt.u32.totalorder %s845_s9, %s951_s0 }
  0x39   : > { %p591_p5 = pnand %p590_p3, %p589_p0  ;;  %p595_p1 = scmp.lt.u32.totalorder %s593_s4, %s588_s19 }
  0x3a   : > { %p597_p4 = scmp.lt.u32.totalorder %s588_s19, %s845_s9 }
  0x3b   : > { %p592_p7 = pneg %p591_p5  ;;  %p596_p2 = por %p595_p1, %p594_p9 }
  0x3d   : > { %p598_p6 = por %p597_p4, %p596_p2 }
  0x3f   : > { %p599_p8 = pnand %p598_p6, %p592_p7 }
  0x41   : > { %602 = shalt.err (!%p599_p8)
}
  0x42   : > { %s603_s26 = scalar_lea.vmem %s847_s10, 128  ;;  %s709_s7 = smov [#allocation2]  }
  0x43   : > { %p604_p12 = scmp.ne.s32.totalorder %s847_s10, %s603_s26  ;;  %s608_s8 = sshll.u32 %s709_s7, 4  ;;  %s609_s8 = int_to_ptr.vmem [resolvable:$false] %s608_s8 }
  0x44   : > { %s610_s21 = scalar_lea.vmem %s609_s8, 256  ;;  %p611_p5 = scmp.lt.s32.totalorder %s847_s10, %s609_s8 }
  0x45   : > { %p606_p11 = pnand %p604_p12, %p590_p3  ;;  %p612_p9 = scmp.lt.s32.totalorder %s610_s21, %s603_s26 }
  0x47   : > { %p607_p0 = pneg %p606_p11  ;;  %p613_p1 = por %p612_p9, %p611_p5 }
  0x49   : > { %p614_p2 = pnand %p613_p1, %p607_p0 }
  0x4b   : > { %617 = shalt.err (!%p614_p2)
}
  0x4c   : > { %497 = dma.hbm_to_vmem [thread:$0]  (!%p851_p13), %s845_s9, 128, %s847_s10, %s178_s18  }
  0x4d   : > { %p969_p7 = scmp.ne.s32.totalorder %s963_s24, 0 }
  0x4e   : > { %s883_s19 = sand.u32 (!%p969_p7), 1, %s688_s13   ;;  %p970_p3 = scmp.ne.s32.totalorder (!%p969_p7), %s961_s22, 0 }
  0x4f   : > { %197 = sbr.rel (%p969_p7) target bundleno = 331 (0x14b), region = 32  ;;  %s451_s25 = sshll.u32 (!%p969_p7), %s883_s19, 3 }
  0x50   : > { %s200_s27 = scalar_lea.sflag (!%p969_p7), [#allocation3], %s883_s19  ;;  %s203_s4 = scalar_lea.vmem (!%p969_p7), [#allocation2], %s451_s25 }
  0x56   : > { %671 = dma.done.wait (%p970_p3), %s200_s27, 128  }
  0x57   : > { %673 = vsyncadd (%p970_p3), %s200_s27, 4294967168  ;;  %p971_p4 = scmp.ne.s32.totalorder %s959_s20, 0 }
  0x59   : > { %675 = dma.done.wait (%p971_p4), [#allocation6], 512  }
  0x5a   : > { %677 = vsyncadd (%p971_p4), [#allocation6], 4294966784  ;;  %v710_v0 = vmov 0.0|0.0   ;;  %vm711_vm0 = vmmov 0   ;;  %v712_v1 = vmov 0.0   ;;  %v237_v2 = vld [vmem:[#allocation5] sm:$0xff] }
  0x5b   : > { %476 = vmatprep.subr.bf16.mxu0 %v710_v0  ;;  %473 = vmatprep.mubr.msk.f32.mxu0 %vm711_vm0, %v712_v1  ;;  %v238_v3 = vld [vmem:[#allocation5 + $0x8] sm:$0xff]  ;;  %v239_v4 = vld [vmem:[#allocation5 + $0x10] sm:$0xff]  ;;  %v240_v6 = vld [vmem:[#allocation5 + $0x18] sm:$0xff]  ;;  %vm248_vm1 = vcmask 261120   ;;  %s457_s24 = sshll.u32 %s696_s15, 7  ;;  %s232_s9 = scalar_lea.vmem [#allocation7], %s451_s25 }
  0x5c   : > { %v477_v5 = vpack.c.bf16 %v238_v3, %v237_v2  ;;  %v480_v7 = vpack.c.bf16 %v240_v6, %v239_v4  ;;  %v236_v8 = vld [vmem:[%s203_s4] sm:$0xff]  ;;  %s339_s10 = sshll.u32 %s232_s9, 4  ;;  %s902_s29 = scalar_lea.hbm %s954_s3, %s457_s24  ;;  %s904_s10 = int_to_ptr.vmem [resolvable:$true] %s339_s10 }
  0x5d   : > { %v454_v9 = vld [vmem:[%s953_s2] ss:$0 sm:$0xff]  ;;  %s325_s6 = scalar_lea.sflag [#allocation4], %s883_s19  ;;  %s618_s26 = scalar_lea.vmem %s904_s10, 128 }
  0x5e   : > { %478 = vmatpush3.bf16.msra.mxu0 %v477_v5  ;;  %p619_p13 = scmp.ne.s32.totalorder %s904_s10, %s618_s26  ;;  %s713_s15 = smov [#allocation7]  }
  0x5f   : > { %479 = vmatprep.subr.bf16.mxu0 %v710_v0  ;;  %s622_s7 = sshll.u32 %s713_s15, 4  ;;  %s623_s7 = int_to_ptr.vmem [resolvable:$false] %s622_s7 }
  0x60   : > { %p620_p6 = pnand %p619_p13, %p830_p10  ;;  %s624_s8 = scalar_lea.vmem %s623_s7, 256 }
  0x61   : > { %p625_p12 = scmp.lt.s32.totalorder %s904_s10, %s623_s7  ;;  %p626_p11 = scmp.lt.s32.totalorder %s624_s8, %s618_s26 }
  0x62   : > { %481 = vmatpush3.bf16.msra.mxu0 %v480_v7  ;;  %p621_p8 = pneg %p620_p6 }
  0x63   : > { %p627_p0 = por %p626_p11, %p625_p12 }
  0x65   : > { %474 = vmatmul.mubr.msk.f32.vlgmr.msra.gmra.mrb[0].mxu0 %vm248_vm1, %v236_v8  ;;  %p628_p5 = pnand %p627_p0, %p621_p8 }
 0x138   : > { %v318_v10 = vpop.f32.mrb[0].mxu0 }
 0x139   : > { %v319_v11 = vadd.f32 %v454_v9, %v318_v10  ;;  %v475_v12 = vpop.f32.mrb[1].mxu0 }
 0x13b   : > { %v322_v13 = vmax.f32 %v319_v11, 0.0 }
 0x13d   : > { %323 = vst.msk [vmem:[%s232_s9] sm:$0xff] %vm248_vm1, %v322_v13 }
 0x13e   : > { %631 = shalt.err (!%p628_p5)
}
 0x13f   : > { %s632_s21 = scalar_lea.hbm %s902_s29, 128  ;;  %s636_s27 = scalar_lea.hbm %s954_s3, 256 }
 0x140   : > { %p633_p9 = scmp.ne.s32.totalorder %s902_s29, %s632_s21  ;;  %p637_p7 = scmp.lt.u32.totalorder %s902_s29, %s954_s3 }
 0x141   : > { %p638_p3 = scmp.lt.u32.totalorder %s636_s27, %s632_s21  ;;  %p640_p13 = scmp.lt.u32.totalorder %s632_s21, %s902_s29 }
 0x142   : > { %p634_p1 = pnand %p633_p9, %p830_p10 }
 0x143   : > { %p639_p4 = por %p638_p3, %p637_p7 }
 0x144   : > { %p635_p2 = pneg %p634_p1 }
 0x145   : > { %p641_p6 = por %p640_p13, %p639_p4 }
 0x147   : > { %p642_p8 = pnand %p641_p6, %p635_p2 }
 0x149   : > { %645 = shalt.err (!%p642_p8)
}
 0x14a   : > { %488 = dma.vmem_to_hbm [thread:$0]  (%p830_p10), %s904_s10, 128, %s902_s29, %s325_s6  }
 0x14b PF: > { %s351_s22 = sand.u32 1, %s684_s12   ;;  %p972_p12 = scmp.ne.s32.totalorder %s962_s23, 0 }
 0x14c   : > { %p973_p11 = scmp.ge.s32.totalorder %s704_s17, 2  ;;  %s352_s24 = scalar_lea.sflag [#allocation4], %s351_s22 }
 0x14e   : > { %p499_p0 = pnand %p973_p11, %p972_p12 }
 0x150   : > { %679 = dma.done.wait (!%p499_p0), %s352_s24, 128  }
 0x151   : > { %681 = vsyncadd (!%p499_p0), %s352_s24, 4294967168  ;;  %s20_s17 = sadd.s32 1, %s704_s17   ;;  %s974_s12 = smov %s688_s13 }
 0x152   : > { %p17_p5 = scmp.ge.s32.totalorder %s20_s17, 4   ;;  %s975_s13 = smov %s692_s14 }
 0x153   : > { %s976_s14 = smov %s839_s5  ;;  %s977_s15 = smov %s700_s16 }
 0x154   : > { %s978_s16 = smov %s980_s28  ;;  %19 = sbr.rel (!%p17_p5) target bundleno = 7 (0x7), region = 85 }
 0x15b   :  { %357 = vsyncpa [#allocation3], 1 }
 0x15c   :  { %359 = vsyncpa [#allocation3 + $0x1], 1 }
 0x15d   :  { %360 = vsyncpa [#allocation6], 1 }
 0x15e   :  { %361 = vsyncpa [#allocation4], 1 }
 0x15f   :  { %363 = vsyncpa [#allocation4 + $0x1], 1 }

</bundles_post_ra>
